<compile_context>
chip_gen: v6e
topology: v6e:2x2x1
jax: 0.10.0
libtpu: 0.0.40
codegen_flags: <defaults>
</compile_context>

<pallas_src>
import jax
import jax.numpy as jnp
from jax.experimental import pallas as pl
from jax.experimental.pallas import tpu as pltpu


def _identity_kernel(x_ref, o_ref):
    # Straight copy of the current VMEM tile.
    o_ref[...] = x_ref[...]


def _pick_lane_width(n):
    # Widest lane-dense (multiple of 128) last axis that divides n exactly,
    # so the output stores are wide unmasked vst and no padding is needed.
    for cand in (4096, 2048, 1024, 512, 256, 128):
        if n % cand == 0:
            return cand
    return 0


def _target_block_bytes():
    # v5e: keep 2 MiB blocks (16 MiB scoped-VMEM default; step overhead <8%).
    # v6e/v7x: 4 MiB blocks amortize per-grid-step overhead against faster HBM
    # while 4 x 4 MiB = 16 MiB stays well under the 32 MiB scoped default.
    try:
        kind = jax.devices()[0].device_kind.lower()
    except Exception:
        kind = ""
    if "v5 lite" in kind or "v5e" in kind or "v5lite" in kind:
        return 2 * 1024 * 1024
    return 4 * 1024 * 1024


def dummy_forward(x):
    """Identity forward pass (equivalent to Dummy.forward) via a Pallas copy kernel."""
    n = int(x.size)
    if n == 0:
        return x

    width = _pick_lane_width(n)
    if width == 0:
        # TODO(synk): an unaligned size could copy the 128-aligned bulk through
        # the kernel plus a tiny tail op; for an identity op, returning x is
        # strictly cheaper (zero HBM traffic), so short-circuit instead.
        return x

    orig_shape = x.shape
    dtype = x.dtype
    itemsize = jnp.dtype(dtype).itemsize
    # dtype-aware sublane packing: 8 rows for 4-byte, 16 for 2-byte, 32 for 1-byte.
    sublane = max(8, 32 // itemsize)

    rows = n // width
    x2d = x.reshape(rows, width)  # free (contiguous) reshape

    row_bytes = width * itemsize
    tile_rows = (_target_block_bytes() // row_bytes) // sublane * sublane
    tile_rows = max(sublane, tile_rows)

    total_bytes = rows * row_bytes
    if rows <= tile_rows and total_bytes >= 512 * 1024:
        # Mid-size tensor that would otherwise be a single block: force ~4 grid
        # steps so input DMA, VMEM copy, and output writeback overlap instead of
        # running serially.
        quarter = pl.cdiv(rows, 4)
        tile_rows = max(sublane, pl.cdiv(quarter, sublane) * sublane)

    if rows <= tile_rows:
        # Single block equal to the full array (allowed regardless of (8,128)).
        block = (rows, width)
        grid = (1,)
    else:
        block = (tile_rows, width)
        # Partial last block (if any) is handled by Pallas masked writeback.
        grid = (pl.cdiv(rows, tile_rows),)

    out2d = pl.pallas_call(
        _identity_kernel,
        out_shape=jax.ShapeDtypeStruct((rows, width), dtype),
        grid_spec=pltpu.PrefetchScalarGridSpec(
            num_scalar_prefetch=0,
            grid=grid,
            in_specs=[pl.BlockSpec(block, lambda i: (i, 0))],
            out_specs=pl.BlockSpec(block, lambda i: (i, 0)),
        ),
        compiler_params=pltpu.CompilerParams(
            dimension_semantics=("parallel",),
        ),
        # No input_output_aliases: input is not donated here, and a non-donated
        # alias makes XLA insert a defensive copy (hidden extra HBM pass).
    )(x2d)

    return out2d.reshape(orig_shape)


if __name__ == "__main__":
    key = jax.random.PRNGKey(0)
    # Small NCHW-shaped input consistent with typical module usage.
    x = jax.random.normal(key, (2, 4, 16, 16), dtype=jnp.float32)

    y = dummy_forward(x)
    jax.block_until_ready(y)

    assert y.shape == x.shape and y.dtype == x.dtype
    assert bool(jnp.all(y == x))
    print("KERNEL_OK")
</pallas_src>

<mosaic_0001>
module attributes {stable_mosaic.version = 11 : i64} {
  func.func @_identity_kernel(%arg0: i32, %arg1: memref<1x2048xf32, #tpu.memory_space<vmem>>, %arg2: memref<1x2048xf32, #tpu.memory_space<vmem>>) attributes {dimension_semantics = [#tpu.dimension_semantics<parallel>], iteration_bounds = array<i64: 1>, scalar_prefetch = 0 : i64, scratch_operands = 0 : i64, tpu.core_type = #tpu.core_type<tc>, window_params = [{transform_indices = @transform_0, window_bounds = array<i64: 1, 2048>}, {transform_indices = @transform_1, window_bounds = array<i64: 1, 2048>}]} {
    %c0 = arith.constant 0 : index
    %c0_0 = arith.constant 0 : index
    %0 = vector.load %arg1[%c0, %c0_0] : memref<1x2048xf32, #tpu.memory_space<vmem>>, vector<1x2048xf32>
    %c0_1 = arith.constant 0 : index
    %c0_2 = arith.constant 0 : index
    %1 = vector.load %arg2[%c0_1, %c0_2] : memref<1x2048xf32, #tpu.memory_space<vmem>>, vector<1x2048xf32>
    tpu.vector_store %arg2[%c0_1, %c0_2], %0 {strides = array<i32>} : memref<1x2048xf32, #tpu.memory_space<vmem>>, vector<1x2048xf32>,
    return
  }
  func.func @transform_0(%arg0: i32) -> (i32, i32) {
    %c0_i32 = arith.constant 0 : i32
    %c0_i32_0 = arith.constant 0 : i32
    return %arg0, %c0_i32 : i32, i32
  }
  func.func @transform_1(%arg0: i32) -> (i32, i32) {
    %c0_i32 = arith.constant 0 : i32
    %c0_i32_0 = arith.constant 0 : i32
    return %arg0, %c0_i32 : i32, i32
  }
}

</mosaic_0001>

<bundles_post_ra>
// kernel: tpu_custom_call.1
= control target key start
LH: loop header
LB: loop body
LE: loop exit
PB: predicated region body
PF: predicated region fallthrough
CT: control target
= control target key end

     0   :  { %6 = vsyncpa [#allocation3], 0  ;;  %s104_s0 = inlined_call_operand.hbm [shape: f32[1,2048], index: 0, kind: input, shape index: {}]   ;;  %s105_s1 = inlined_call_operand.hbm [shape: f32[1,2048], index: 1, kind: output, shape index: {}]  }
   0x1   :  { %7 = vsyncpa [#allocation4], 0  ;;  %s86_s6 = smov [#allocation2]  }
   0x2   :  { %s14_s7 = sshll.u32 %s86_s6, 4  ;;  %s15_s7 = int_to_ptr.vmem [resolvable:$true] %s14_s7 }
   0x3   :  { %s50_s8 = scalar_lea.vmem %s15_s7, 256  ;;  %p55_p1 = scmp.lt.s32.totalorder %s15_s7, %s15_s7 }
   0x4   :  { %p51_p0 = scmp.ne.s32.totalorder %s15_s7, %s50_s8  ;;  %p56_p2 = scmp.lt.s32.totalorder %s50_s8, %s50_s8 }
   0x6   :  { %p57_p3 = por %p56_p2, %p55_p1 }
   0x8   :  { %p58_p4 = pnand %p57_p3, %p51_p0 }
   0xa   :  { %61 = shalt.err (!%p58_p4)
}
   0xb   :  { %17 = dma.hbm_to_vmem [thread:$0]  %s104_s0, 256, %s15_s7, [#allocation3]  }
   0xc   :  { %82 = dma.done.wait [#allocation3], 256  }
   0xd   :  { %83 = vsyncadd [#allocation3], 4294967040  ;;  %s87_s11 = smov [#allocation5]   ;;  %v21_v0 = vld [vmem:[#allocation2] sm:$0xff]  ;;  %v22_v1 = vld [vmem:[#allocation2 + $0x8] sm:$0xff] }
   0xe   :  { %s31_s12 = sshll.u32 %s87_s11, 4  ;;  %23 = vst [vmem:[#allocation5] sm:$0xff] %v21_v0  ;;  %24 = vst [vmem:[#allocation5 + $0x8] sm:$0xff] %v22_v1  ;;  %s32_s12 = int_to_ptr.vmem [resolvable:$true] %s31_s12 }
   0xf   :  { %s62_s13 = scalar_lea.vmem %s32_s12, 256  ;;  %p67_p6 = scmp.lt.s32.totalorder %s32_s12, %s32_s12 }
  0x10   :  { %p63_p5 = scmp.ne.s32.totalorder %s32_s12, %s62_s13  ;;  %p68_p7 = scmp.lt.s32.totalorder %s62_s13, %s62_s13 }
  0x12   :  { %p69_p8 = por %p68_p7, %p67_p6 }
  0x14   :  { %p70_p9 = pnand %p69_p8, %p63_p5 }
  0x16   :  { %73 = shalt.err (!%p70_p9)
}
  0x17   :  { %34 = dma.vmem_to_hbm [thread:$0]  %s32_s12, 256, %s105_s1, [#allocation4]  }
  0x18   :  { %84 = dma.done.wait [#allocation4], 256  }
  0x19   :  { %85 = vsyncadd [#allocation4], 4294967040 }
  0x1a   :  { %38 = vsyncpa [#allocation3], 1 }
  0x1b   :  { %39 = vsyncpa [#allocation4], 1 }

</bundles_post_ra>
